<compile_context>
chip_gen: v7x
topology: tpu7x:2x2x1
jax: 0.10.0
libtpu: 0.0.40
codegen_flags: <defaults>
</compile_context>

<pallas_src>
import jax
import jax.numpy as jnp
from jax.experimental import pallas as pl
from jax.experimental.pallas import tpu as pltpu


def _make_transition_kernel(matmul_dtype):
    def transition_kernel(x_ref, scale_ref, bias_ref, w_ref, o_ref):
        # x_ref:     (1, 4, Cin, Mt)  space-to-depth input, channels-major
        # scale_ref: (Cin, 1)         folded BN scale * 0.25
        # bias_ref:  (Cin, 1)         folded BN bias  * 0.25
        # w_ref:     (Cout, Cin)      1x1 conv weight
        # o_ref:     (1, Cout, Mt)
        s = scale_ref[...]            # (Cin, 1) — lane-broadcast inside the FMAs
        b = bias_ref[...]

        # BatchNorm (folded) + ReLU + 2x2 average pool, all on the VPU.
        # The 1/4 factor is already folded into s and b.
        p = jnp.maximum(x_ref[0, 0] * s + b, 0.0)
        p = p + jnp.maximum(x_ref[0, 1] * s + b, 0.0)
        p = p + jnp.maximum(x_ref[0, 2] * s + b, 0.0)
        p = p + jnp.maximum(x_ref[0, 3] * s + b, 0.0)      # (Cin, Mt)

        # 1x1 convolution == channel matmul on the MXU (4x fewer flops than
        # conv-before-pool; f32 accumulation regardless of input dtype).
        z = jnp.dot(w_ref[...].astype(matmul_dtype), p.astype(matmul_dtype),
                    preferred_element_type=jnp.float32)    # (Cout, Mt)

        o_ref[0] = z.astype(o_ref.dtype)

    return transition_kernel


def _pick_spatial_tile(m, cin, target_bytes=4 << 20):
    """Tile size (in flattened pooled-space positions) for the (4, Cin, Mt)
    f32 input block.  Mt must divide m and be a multiple of 128 (lane width)
    unless it equals the full extent m."""
    if m <= 256:
        return m
    tgt = max(128, target_bytes // (4 * cin * 4))
    t = (min(m, tgt) // 128) * 128
    while t >= 128:
        if m % t == 0:
            return t
        t -= 128
    return m


def transition_forward(x_nchw, gamma, beta, conv_w, eps=1e-5,
                       matmul_dtype=jnp.float32):
    """x_nchw: (N, Cin, H, W); conv_w: (Cout, Cin, 1, 1) as in PyTorch.

    matmul_dtype=jnp.bfloat16 is an optional v6e/v7x lever when the kernel is
    MXU-bound at large Cin/Cout (accumulation stays f32 either way)."""
    N, Cin, H, W = x_nchw.shape
    Cout = conv_w.shape[0]
    assert H % 2 == 0 and W % 2 == 0, "2x2 avg-pool path assumes even H, W"
    Hh, Wh = H // 2, W // 2
    M = Hh * Wh

    x = x_nchw.astype(jnp.float32)

    # BatchNorm (training-mode batch statistics, biased variance) folded into
    # a per-channel scale/bias.  mean and E[x^2] are independent reductions
    # over the same operand, so XLA fuses them into a single pass over x.
    ex = jnp.mean(x, axis=(0, 2, 3))
    ex2 = jnp.mean(x * x, axis=(0, 2, 3))
    var = jnp.maximum(ex2 - ex * ex, 0.0)
    inv = gamma * jax.lax.rsqrt(var + eps)
    # Fold the 2x2 avg-pool's 1/4 into scale/bias (relu is pos. homogeneous).
    scale = (0.25 * inv).reshape(Cin, 1)
    bias = (0.25 * (beta - ex * inv)).reshape(Cin, 1)

    # Space-to-depth, channels-major: (N, Cin, H, W) -> (N, 4, Cin, Hh*Wh),
    # xs[n, 2*dh+dw, c, i*Wh+j] = x[n, c, 2*i+dh, 2*j+dw].  One XLA transpose
    # (replaces the previous NCHW->NHWC transpose; no extra HBM pass).
    xs = x.reshape(N, Cin, Hh, 2, Wh, 2)
    xs = jnp.transpose(xs, (0, 3, 5, 1, 2, 4)).reshape(N, 4, Cin, M)

    w_mat = conv_w[:, :, 0, 0].astype(jnp.float32)        # (Cout, Cin)

    Mt = _pick_spatial_tile(M, Cin)
    grid = (N, M // Mt)

    cost = pl.CostEstimate(
        flops=int(2 * N * M * Cin * Cout + 16 * N * M * Cin),
        transcendentals=0,
        bytes_accessed=int(4 * (xs.size + N * Cout * M + w_mat.size + 2 * Cin)),
    )

    out_flat = pl.pallas_call(
        _make_transition_kernel(matmul_dtype),
        out_shape=jax.ShapeDtypeStruct((N, Cout, M), jnp.float32),
        grid=grid,
        in_specs=[
            pl.BlockSpec((1, 4, Cin, Mt), lambda n, t: (n, 0, 0, t)),
            pl.BlockSpec((Cin, 1), lambda n, t: (0, 0)),
            pl.BlockSpec((Cin, 1), lambda n, t: (0, 0)),
            pl.BlockSpec((Cout, Cin), lambda n, t: (0, 0)),
        ],
        out_specs=pl.BlockSpec((1, Cout, Mt), lambda n, t: (n, 0, t)),
        compiler_params=pltpu.CompilerParams(
            dimension_semantics=("parallel", "parallel")),
        cost_estimate=cost,
    )(xs, scale, bias, w_mat)

    # (N, Cout, Hh*Wh) -> NCHW via a free reshape (no output transpose pass).
    return out_flat.reshape(N, Cout, Hh, Wh)


def transition_reference(x, gamma, beta, conv_w, eps=1e-5):
    """Plain-JAX reference of the PyTorch forward (NCHW, conv-then-pool)."""
    mean = jnp.mean(x, axis=(0, 2, 3), keepdims=True)
    var = jnp.mean((x - mean) ** 2, axis=(0, 2, 3), keepdims=True)
    xn = (x - mean) / jnp.sqrt(var + eps)
    xn = xn * gamma[None, :, None, None] + beta[None, :, None, None]
    y = jnp.maximum(xn, 0.0)
    z = jnp.einsum('nchw,oc->nohw', y, conv_w[:, :, 0, 0])
    N, Co, H, W = z.shape
    return z.reshape(N, Co, H // 2, 2, W // 2, 2).mean(axis=(3, 5))


if __name__ == "__main__":
    key = jax.random.PRNGKey(0)
    k_x, k_w, k_g, k_b = jax.random.split(key, 4)

    N, Cin, H, W = 2, 4, 16, 16
    Cout = 2  # DenseNet transition reduces channels

    x = jax.random.normal(k_x, (N, Cin, H, W), dtype=jnp.float32)
    # Kaiming-style deterministic init for the 1x1 conv (bias=False in module).
    conv_w = jax.random.normal(k_w, (Cout, Cin, 1, 1), dtype=jnp.float32) * (2.0 / Cin) ** 0.5
    gamma = 1.0 + 0.1 * jax.random.normal(k_g, (Cin,), dtype=jnp.float32)
    beta = 0.1 * jax.random.normal(k_b, (Cin,), dtype=jnp.float32)

    out = transition_forward(x, gamma, beta, conv_w)
    out = jax.block_until_ready(out)

    ref = transition_reference(x, gamma, beta, conv_w)
    assert out.shape == (N, Cout, H // 2, W // 2), out.shape
    assert jnp.allclose(out, ref, atol=1e-4, rtol=1e-4), "mismatch vs reference"

    print("KERNEL_OK")
</pallas_src>

<mosaic_0001>
module attributes {stable_mosaic.version = 11 : i64} {
  func.func @transition_kernel(%arg0: i32, %arg1: i32, %arg2: memref<1x4x4x64xf32, #tpu.memory_space<vmem>>, %arg3: memref<4x1xf32, #tpu.memory_space<vmem>>, %arg4: memref<4x1xf32, #tpu.memory_space<vmem>>, %arg5: memref<2x4xf32, #tpu.memory_space<vmem>>, %arg6: memref<1x2x64xf32, #tpu.memory_space<vmem>>) attributes {dimension_semantics = [#tpu.dimension_semantics<parallel>, #tpu.dimension_semantics<parallel>], iteration_bounds = array<i64: 2, 1>, scalar_prefetch = 0 : i64, scratch_operands = 0 : i64, tpu.core_type = #tpu.core_type<tc>, window_params = [{transform_indices = @transform_0, window_bounds = array<i64: 1, 4, 4, 64>}, {pipeline_mode = #tpu.pipeline_mode<synchronous>, transform_indices = @transform_1, window_bounds = array<i64: 4, 1>}, {pipeline_mode = #tpu.pipeline_mode<synchronous>, transform_indices = @transform_2, window_bounds = array<i64: 4, 1>}, {pipeline_mode = #tpu.pipeline_mode<synchronous>, transform_indices = @transform_3, window_bounds = array<i64: 2, 4>}, {transform_indices = @transform_4, window_bounds = array<i64: 1, 2, 64>}]} {
    %c0 = arith.constant 0 : index
    %c0_0 = arith.constant 0 : index
    %0 = vector.load %arg3[%c0, %c0_0] : memref<4x1xf32, #tpu.memory_space<vmem>>, vector<4x1xf32>
    %c0_1 = arith.constant 0 : index
    %c0_2 = arith.constant 0 : index
    %1 = vector.load %arg4[%c0_1, %c0_2] : memref<4x1xf32, #tpu.memory_space<vmem>>, vector<4x1xf32>
    %c0_3 = arith.constant 0 : index
    %c0_4 = arith.constant 0 : index
    %c0_5 = arith.constant 0 : index
    %c0_6 = arith.constant 0 : index
    %2 = vector.load %arg2[%c0_3, %c0_4, %c0_5, %c0_6] : memref<1x4x4x64xf32, #tpu.memory_space<vmem>>, vector<1x1x4x64xf32>
    %3 = vector.shape_cast %2 : vector<1x1x4x64xf32> to vector<4x64xf32>
    %4 = vector.broadcast %0 : vector<4x1xf32> to vector<4x64xf32>
    %5 = arith.mulf %3, %4 : vector<4x64xf32>
    %6 = vector.broadcast %1 : vector<4x1xf32> to vector<4x64xf32>
    %7 = arith.addf %5, %6 : vector<4x64xf32>
    %cst = arith.constant 0.000000e+00 : f32
    %8 = vector.broadcast %cst : f32 to vector<4x64xf32>
    %9 = arith.maximumf %7, %8 : vector<4x64xf32>
    %c0_7 = arith.constant 0 : index
    %c1 = arith.constant 1 : index
    %c0_8 = arith.constant 0 : index
    %c0_9 = arith.constant 0 : index
    %10 = vector.load %arg2[%c0_7, %c1, %c0_8, %c0_9] : memref<1x4x4x64xf32, #tpu.memory_space<vmem>>, vector<1x1x4x64xf32>
    %11 = vector.shape_cast %10 : vector<1x1x4x64xf32> to vector<4x64xf32>
    %12 = vector.broadcast %0 : vector<4x1xf32> to vector<4x64xf32>
    %13 = arith.mulf %11, %12 : vector<4x64xf32>
    %14 = vector.broadcast %1 : vector<4x1xf32> to vector<4x64xf32>
    %15 = arith.addf %13, %14 : vector<4x64xf32>
    %cst_10 = arith.constant 0.000000e+00 : f32
    %16 = vector.broadcast %cst_10 : f32 to vector<4x64xf32>
    %17 = arith.maximumf %15, %16 : vector<4x64xf32>
    %18 = arith.addf %9, %17 : vector<4x64xf32>
    %c0_11 = arith.constant 0 : index
    %c2 = arith.constant 2 : index
    %c0_12 = arith.constant 0 : index
    %c0_13 = arith.constant 0 : index
    %19 = vector.load %arg2[%c0_11, %c2, %c0_12, %c0_13] : memref<1x4x4x64xf32, #tpu.memory_space<vmem>>, vector<1x1x4x64xf32>
    %20 = vector.shape_cast %19 : vector<1x1x4x64xf32> to vector<4x64xf32>
    %21 = vector.broadcast %0 : vector<4x1xf32> to vector<4x64xf32>
    %22 = arith.mulf %20, %21 : vector<4x64xf32>
    %23 = vector.broadcast %1 : vector<4x1xf32> to vector<4x64xf32>
    %24 = arith.addf %22, %23 : vector<4x64xf32>
    %cst_14 = arith.constant 0.000000e+00 : f32
    %25 = vector.broadcast %cst_14 : f32 to vector<4x64xf32>
    %26 = arith.maximumf %24, %25 : vector<4x64xf32>
    %27 = arith.addf %18, %26 : vector<4x64xf32>
    %c0_15 = arith.constant 0 : index
    %c3 = arith.constant 3 : index
    %c0_16 = arith.constant 0 : index
    %c0_17 = arith.constant 0 : index
    %28 = vector.load %arg2[%c0_15, %c3, %c0_16, %c0_17] : memref<1x4x4x64xf32, #tpu.memory_space<vmem>>, vector<1x1x4x64xf32>
    %29 = vector.shape_cast %28 : vector<1x1x4x64xf32> to vector<4x64xf32>
    %30 = vector.broadcast %0 : vector<4x1xf32> to vector<4x64xf32>
    %31 = arith.mulf %29, %30 : vector<4x64xf32>
    %32 = vector.broadcast %1 : vector<4x1xf32> to vector<4x64xf32>
    %33 = arith.addf %31, %32 : vector<4x64xf32>
    %cst_18 = arith.constant 0.000000e+00 : f32
    %34 = vector.broadcast %cst_18 : f32 to vector<4x64xf32>
    %35 = arith.maximumf %33, %34 : vector<4x64xf32>
    %36 = arith.addf %27, %35 : vector<4x64xf32>
    %c0_19 = arith.constant 0 : index
    %c0_20 = arith.constant 0 : index
    %37 = vector.load %arg5[%c0_19, %c0_20] : memref<2x4xf32, #tpu.memory_space<vmem>>, vector<2x4xf32>
    %cst_21 = arith.constant dense<0.000000e+00> : vector<2x64xf32>
    %38 = tpu.matmul %37, %36, %cst_21 {dimension_numbers = #tpu.dot_dimension_numbers<[1], [0], [0], [1], [0, 0, 1, 1], [], []>} : vector<2x4xf32>, vector<4x64xf32>, vector<2x64xf32> -> vector<2x64xf32>
    %c0_22 = arith.constant 0 : index
    %c0_23 = arith.constant 0 : index
    %c0_24 = arith.constant 0 : index
    %39 = vector.load %arg6[%c0_22, %c0_23, %c0_24] : memref<1x2x64xf32, #tpu.memory_space<vmem>>, vector<1x2x64xf32>
    %40 = vector.shape_cast %39 : vector<1x2x64xf32> to vector<2x64xf32>
    %41 = vector.shape_cast %38 : vector<2x64xf32> to vector<1x2x64xf32>
    tpu.vector_store %arg6[%c0_22, %c0_23, %c0_24], %41 {strides = array<i32>} : memref<1x2x64xf32, #tpu.memory_space<vmem>>, vector<1x2x64xf32>,
    return
  }
  func.func @transform_0(%arg0: i32, %arg1: i32) -> (i32, i32, i32, i32) {
    %c0_i32 = arith.constant 0 : i32
    %c0_i32_0 = arith.constant 0 : i32
    %c0_i32_1 = arith.constant 0 : i32
    return %arg0, %c0_i32, %c0_i32_0, %arg1 : i32, i32, i32, i32
  }
  func.func @transform_1(%arg0: i32, %arg1: i32) -> (i32, i32) {
    %c0_i32 = arith.constant 0 : i32
    %c0_i32_0 = arith.constant 0 : i32
    %c0_i32_1 = arith.constant 0 : i32
    return %c0_i32, %c0_i32_0 : i32, i32
  }
  func.func @transform_2(%arg0: i32, %arg1: i32) -> (i32, i32) {
    %c0_i32 = arith.constant 0 : i32
    %c0_i32_0 = arith.constant 0 : i32
    %c0_i32_1 = arith.constant 0 : i32
    return %c0_i32, %c0_i32_0 : i32, i32
  }
  func.func @transform_3(%arg0: i32, %arg1: i32) -> (i32, i32) {
    %c0_i32 = arith.constant 0 : i32
    %c0_i32_0 = arith.constant 0 : i32
    %c0_i32_1 = arith.constant 0 : i32
    return %c0_i32, %c0_i32_0 : i32, i32
  }
  func.func @transform_4(%arg0: i32, %arg1: i32) -> (i32, i32, i32) {
    %c0_i32 = arith.constant 0 : i32
    %c0_i32_0 = arith.constant 0 : i32
    return %arg0, %c0_i32, %arg1 : i32, i32, i32
  }
}

</mosaic_0001>

<bundles_post_ra>
// kernel: tpu_custom_call.1
= control target key start
LH: loop header
LB: loop body
LE: loop exit
PB: predicated region body
PF: predicated region fallthrough
CT: control target
= control target key end

     0   :  { %9 = vsyncpa [#allocation3], 0  ;;  %s868_s0 = inlined_call_operand.hbm [shape: f32[2,4,4,64], index: 0, kind: input, shape index: {}]   ;;  %s869_s1 = inlined_call_operand.vmem [shape: f32[4,1], index: 1, kind: input, shape index: {}]   ;;  %s870_s2 = inlined_call_operand.vmem [shape: f32[4,1], index: 2, kind: input, shape index: {}]   ;;  %s871_s3 = inlined_call_operand.vmem [shape: f32[2,4], index: 3, kind: input, shape index: {}]   ;;  %s872_s4 = inlined_call_operand.hbm [shape: f32[2,2,64], index: 4, kind: output, shape index: {}]  }
   0x1   :  { %11 = vsyncpa [#allocation3 + $0x1], 0 }
   0x2   :  { %12 = vsyncpa [#allocation4], 0 }
   0x3   :  { %14 = vsyncpa [#allocation4 + $0x1], 0  ;;  %s685_s15 = smov 0   ;;  %s687_s16 = smov 0  }
   0x4   :  { %s689_s17 = smov 0   ;;  %s691_s18 = smov 0  }
   0x5   :  { %s693_s19 = smov 0   ;;  %s695_s20 = smov 0  }
   0x6 LB: > { %s444_s21 = sadd.s32 4294967295, %s651_s20   ;;  %s445_s22 = sadd.s32 4294967294, %s651_s20   ;;  %s651_s20 = sphi %s695_s20, %s20_s20   ;;  %s647_s19 = sphi %s693_s19, %s887_s19   ;;  %s643_s18 = sphi %s691_s18, %s886_s18   ;;  %s639_s17 = sphi %s689_s17, %s885_s17   ;;  %s635_s16 = sphi %s687_s16, %s884_s16   ;;  %s631_s15 = sphi %s685_s15, %s883_s15  }
   0x7   : > { %s32_s23 = sadd.s32 1, %s647_s19  ;;  %s41_s24 = sadd.s32 1, %s639_s17 }
   0x8   : > { %p34_p0 = scmp.ge.s32.totalorder %s32_s23, 2  ;;  %p48_p1 = scmp.ne.s32.totalorder %s639_s17, %s635_s16 }
   0x9   : > { %p49_p2 = scmp.eq.s32.totalorder %s651_s20, 0  ;;  %p54_p3 = scmp.ne.s32.totalorder %s635_s16, %s631_s15 }
   0xa   : > { %s889_s23 = smov (%p34_p0, %s32_s23), 0  ;;  %p55_p5 = scmp.eq.s32.totalorder %s444_s21, 0 }
   0xb   : > { %p726_p4 = por %p49_p2, %p48_p1  ;;  %s36_s26 = ssub.s32 %s647_s19, %s889_s23 }
   0xc   : > { %p143_p6 = scmp.eq.s32.totalorder %s444_s21, 1  ;;  %p39_p7 = scmp.eq.s32.totalorder %s36_s26, 0 }
   0xd   : > { %p732_p8 = por %p55_p5, %p54_p3  ;;  %p149_p10 = scmp.eq.s32.totalorder %s445_s22, 1 }
   0xe   : > { %p736_p9 = por %p143_p6, %p48_p1  ;;  %p483_p13 = scmp.lt.s32.totalorder %s651_s20, 2 }
   0xf   : > { %s741_s29 = scalar_select %p39_p7, %s639_s17, %s41_s24  }
  0x10   : > { %s876_s28 = scalar_select %p736_p9, 1, 0 }
  0x11   : > { %p743_p11 = por %p149_p10, %p54_p3  ;;  %s178_s5 = sand.u32 1, %s639_s17  }
  0x12   : > { %s448_s6 = sshll.u32 %s178_s5, 4  ;;  %s463_s7 = sshll.u32 %s647_s19, 8 }
  0x13   : > { %s877_s30 = scalar_select %p743_p11, 1, 0 }
  0x14   : > { %s754_s10 = scalar_lea.hbm %s868_s0, %s463_s7  ;;  %s182_s11 = scalar_lea.vmem [#allocation2], %s448_s6 }
  0x15   : > { %s190_s12 = sshll.u32 %s182_s11, 4  ;;  %p760_p0 = pnand %p483_p13, %p726_p4  ;;  %s756_s12 = int_to_ptr.vmem [resolvable:$true] %s190_s12 }
  0x16   : > { %s765_s14 = scalar_lea.sflag [#allocation3], %s178_s5  ;;  %s539_s21 = scalar_lea.hbm %s754_s10, 256 }
  0x17   : > { %p540_p2 = scmp.ne.s32.totalorder %s754_s10, %s539_s21  ;;  %p541_p3 = pneg %p760_p0 }
  0x18   : > { %s544_s25 = scalar_lea.hbm %s868_s0, 512  ;;  %p545_p4 = scmp.lt.u32.totalorder %s754_s10, %s868_s0 }
  0x19   : > { %p542_p5 = pnand %p541_p3, %p540_p2  ;;  %p546_p7 = scmp.lt.u32.totalorder %s544_s25, %s539_s21 }
  0x1a   : > { %p548_p13 = scmp.lt.u32.totalorder %s539_s21, %s754_s10 }
  0x1b   : > { %p543_p6 = pneg %p542_p5  ;;  %p547_p10 = por %p546_p7, %p545_p4 }
  0x1d   : > { %p549_p12 = por %p548_p13, %p547_p10 }
  0x1f   : > { %p550_p1 = pnand %p549_p12, %p543_p6 }
  0x21   : > { %553 = shalt.err (!%p550_p1)
}
  0x22   : > { %s554_s5 = scalar_lea.vmem %s756_s12, 256  ;;  %s653_s7 = smov [#allocation2]  }
  0x23   : > { %p555_p2 = scmp.ne.s32.totalorder %s756_s12, %s554_s5  ;;  %s559_s8 = sshll.u32 %s653_s7, 4  ;;  %s560_s8 = int_to_ptr.vmem [resolvable:$false] %s559_s8 }
  0x24   : > { %s561_s9 = scalar_lea.vmem %s560_s8, 512  ;;  %p562_p9 = scmp.lt.s32.totalorder %s756_s12, %s560_s8 }
  0x25   : > { %p557_p5 = pnand %p555_p2, %p541_p3  ;;  %p563_p4 = scmp.lt.s32.totalorder %s561_s9, %s554_s5 }
  0x27   : > { %p558_p11 = pneg %p557_p5  ;;  %p564_p7 = por %p563_p4, %p562_p9 }
  0x29   : > { %p565_p10 = pnand %p564_p7, %p558_p11 }
  0x2b   : > { %568 = shalt.err (!%p565_p10)
}
  0x2c   : > { %s654_s11 = smov 64   ;;  %s655_s21 = smov 4  }
  0x2d   : > { %478 = dma.hbm_to_vmem [thread:$0]  (!%p760_p0), %s754_s10, 256, %s756_s12, %s765_s14, %s654_s11, %s654_s11, %s655_s21  }
  0x2e   : > { %p198_p12 = scmp.lt.s32.totalorder %s651_s20, 3  ;;  %p879_p1 = scmp.ge.s32.totalorder %s651_s20, 1 }
  0x30   : > { %p199_p3 = pnand %p879_p1, %p198_p12 }
  0x31   : > { %s797_s22 = sand.u32 (!%p199_p3), 1, %s635_s16  }
  0x32   : > { %202 = sbr.rel (%p199_p3) target bundleno = 429 (0x1ad), region = 36  ;;  %s452_s24 = sshll.u32 (!%p199_p3), %s797_s22, 4 }
  0x33   : > { %s205_s25 = scalar_lea.sflag (!%p199_p3), [#allocation3], %s797_s22  ;;  %s208_s26 = scalar_lea.vmem (!%p199_p3), [#allocation2], %s452_s24 }
  0x39   : > { %622 = dma.done.wait (%p732_p8), %s205_s25, 256  }
  0x3a   : > { %624 = vsyncadd (%p732_p8), %s205_s25, 4294967040  ;;  %v656_v0 = vmov 0   ;;  %v233_v1 = vld [vmem:[%s869_s1] sm:$0xf]  ;;  %v657_v3 = vmov 0.0   ;;  %vm658_vm0 = vmmov 0  }
  0x3b   : > { %538 = vset.pattern.permute.xlu0 %v656_v0  ;;  %v234_v2 = vld [vmem:[%s870_s2] sm:$0xf]  ;;  %466 = vmatprep.subr.mxu0 %v657_v3  ;;  %v454_v6 = vld [vmem:[%s208_s26 + $0x4] sm:$0xf]  ;;  %v455_v7 = vld [vmem:[%s208_s26 + $0x8] sm:$0xf] }
  0x3c   : > { %238 = vperm.xlu0 %538, %v233_v1   ;;  %468 = vmatprep.mubr.msk.f32.mxu0 %vm658_vm0, %v657_v3  ;;  %v235_v5 = vld [vmem:[%s208_s26] sm:$0xf]  ;;  %v456_v8 = vld [vmem:[%s208_s26 + $0xc] sm:$0xf]  ;;  %vm272_vm1 = vcmask 1043456   ;;  %vm268_vm2 = vcmask 31744  }
  0x3d   : > { %v267_v25 = vld [vmem:[%s871_s3] sm:$0x3]  ;;  %s453_s5 = sshll.u32 %s797_s22, 1  ;;  %s460_s7 = sshll.u32 %s643_s18, 5  ;;  %vm346_vm3 = vcmask 517120  }
  0x3e   : > { %s232_s8 = scalar_lea.vmem [#allocation5], %s453_s5  ;;  %s819_s24 = scalar_lea.hbm %s872_s4, %s460_s7 }
  0x3f   : > { %s363_s9 = sshll.u32 %s232_s8, 4  ;;  %s349_s25 = scalar_lea.sflag [#allocation4], %s797_s22  ;;  %s821_s9 = int_to_ptr.vmem [resolvable:$true] %s363_s9 }
  0x40   : > { %244 = vperm.xlu0 %538, %v234_v2   ;;  %s569_s26 = scalar_lea.vmem %s821_s9, 32  ;;  %p880_p9 = scmp.ne.s32.totalorder %s876_s28, 0 }
  0x41   : > { %p570_p8 = scmp.ne.s32.totalorder %s821_s9, %s569_s26  ;;  %s659_s18 = smov [#allocation5]  }
  0x42   : > { %s573_s10 = sshll.u32 %s659_s18, 4  ;;  %s574_s10 = int_to_ptr.vmem [resolvable:$false] %s573_s10 }
  0x43   : > { %p571_p11 = pnand %p570_p8, %p880_p9  ;;  %s575_s12 = scalar_lea.vmem %s574_s10, 64 }
  0x44   : > { %p576_p6 = scmp.lt.s32.totalorder %s821_s9, %s574_s10  ;;  %p577_p13 = scmp.lt.s32.totalorder %s575_s12, %s569_s26 }
  0x45   : > { %p572_p0 = pneg %p571_p11 }
  0x46   : > { %p578_p2 = por %p577_p13, %p576_p6 }
  0x48   : > { %p579_p5 = pnand %p578_p2, %p572_p0 }
  0xbb   : > { %v239_v4 = vpop.permute.xlu0 %238 }
  0xbc   : > { %v241_v9 = vmul.f32 %v239_v4, %v235_v5  ;;  %v251_v10 = vmul.f32 %v454_v6, %v239_v4  ;;  %v257_v11 = vmul.f32 %v455_v7, %v239_v4  ;;  %v263_v13 = vmul.f32 %v456_v8, %v239_v4 }
  0xbf   : > { %v245_v12 = vpop.permute.xlu0 %244 }
  0xc0   : > { %v247_v14 = vadd.f32 %v245_v12, %v241_v9  ;;  %v252_v15 = vadd.f32 %v251_v10, %v245_v12  ;;  %v258_v16 = vadd.f32 %v257_v11, %v245_v12  ;;  %v264_v19 = vadd.f32 %v263_v13, %v245_v12 }
  0xc2   : > { %v248_v17 = vmax.f32 %v247_v14, 0.0  ;;  %v253_v18 = vmax.f32 %v252_v15, 0.0  ;;  %v259_v21 = vmax.f32 %v258_v16, 0.0  ;;  %v265_v22 = vmax.f32 %v264_v19, 0.0 }
  0xc4   : > { %v254_v20 = vadd.f32 %v253_v18, %v248_v17 }
  0xc6   : > { %v260_v23 = vadd.f32 %v259_v21, %v254_v20 }
  0xc8   : > { %v266_v24 = vadd.f32 %v265_v22, %v260_v23 }
  0xca   : > { %467 = vmatpush3.msk.msra.mxu0 %vm272_vm1, %v266_v24 }
  0xcb   : > { %469 = vmatmul.mubr.msk.f32.vlgmr.msra.gmra.mrb[0].mxu0 %vm268_vm2, %v267_v25 }
 0x19e   : > { %v342_v26 = vpop.f32.mrb[0].mxu0 }
 0x19f   : > { %347 = vst.msk [vmem:[%s232_s8] sm:$0x3] %vm346_vm3, %v342_v26  ;;  %v470_v27 = vpop.f32.mrb[1].mxu0 }
 0x1a0   : > { %582 = shalt.err (!%p579_p5)
}
 0x1a1   : > { %s583_s22 = scalar_lea.hbm %s819_s24, 32  ;;  %s587_s27 = scalar_lea.hbm %s872_s4, 64 }
 0x1a2   : > { %p584_p4 = scmp.ne.s32.totalorder %s819_s24, %s583_s22  ;;  %p588_p12 = scmp.lt.u32.totalorder %s819_s24, %s872_s4 }
 0x1a3   : > { %p589_p1 = scmp.lt.u32.totalorder %s587_s27, %s583_s22  ;;  %p591_p8 = scmp.lt.u32.totalorder %s583_s22, %s819_s24 }
 0x1a4   : > { %p585_p7 = pnand %p584_p4, %p880_p9 }
 0x1a5   : > { %p590_p3 = por %p589_p1, %p588_p12 }
 0x1a6   : > { %p586_p10 = pneg %p585_p7 }
 0x1a7   : > { %p592_p11 = por %p591_p8, %p590_p3 }
 0x1a9   : > { %p593_p0 = pnand %p592_p11, %p586_p10 }
 0x1ab   : > { %596 = shalt.err (!%p593_p0)
}
 0x1ac   : > { %473 = dma.vmem_to_hbm [thread:$0]  (%p880_p9), %s821_s9, 32, %s819_s24, %s349_s25  }
 0x1ad PF: > { %s375_s7 = sand.u32 1, %s631_s15   ;;  %p881_p6 = scmp.ne.s32.totalorder %s877_s30, 0 }
 0x1ae   : > { %p882_p13 = scmp.ge.s32.totalorder %s651_s20, 2  ;;  %s376_s8 = scalar_lea.sflag [#allocation4], %s375_s7 }
 0x1b0   : > { %p480_p2 = pnand %p882_p13, %p881_p6 }
 0x1b2   : > { %626 = dma.done.wait (!%p480_p2), %s376_s8, 32  }
 0x1b3   : > { %628 = vsyncadd (!%p480_p2), %s376_s8, 4294967264  ;;  %s20_s20 = sadd.s32 1, %s651_s20   ;;  %s883_s15 = smov %s635_s16 }
 0x1b4   : > { %p17_p5 = scmp.ge.s32.totalorder %s20_s20, 4   ;;  %s884_s16 = smov %s639_s17 }
 0x1b5   : > { %s885_s17 = smov %s741_s29  ;;  %s886_s18 = smov %s647_s19 }
 0x1b6   : > { %s887_s19 = smov %s889_s23  ;;  %19 = sbr.rel (!%p17_p5) target bundleno = 6 (0x6), region = 84 }
 0x1bd   :  { %381 = vsyncpa [#allocation3], 1 }
 0x1be   :  { %383 = vsyncpa [#allocation3 + $0x1], 1 }
 0x1bf   :  { %384 = vsyncpa [#allocation4], 1 }
 0x1c0   :  { %386 = vsyncpa [#allocation4 + $0x1], 1 }

</bundles_post_ra>
